<compile_context>
chip_gen: v7x
topology: tpu7x:2x2x1
jax: 0.10.0
libtpu: 0.0.40
codegen_flags: <defaults>
</compile_context>

<pallas_src>
import jax
import jax.numpy as jnp
from jax.experimental import pallas as pl
from jax.experimental.pallas import tpu as pltpu

_LANE = 128
_MAX_BLOCK_ROWS = 1024  # 1024 x 128 f32 = 512 KiB per block


def _copy_kernel(x_ref, o_ref):
    # SetNet.forward(x) == x — pure passthrough of the current tile.
    o_ref[...] = x_ref[...]


def setnet_forward(x, input_dim=None, output_dim=None, use_pallas=True):
    """Pallas implementation of SetNet.forward (identity).

    `input_dim` / `output_dim` mirror the PyTorch __init__ signature; the
    reference module defines no parameters and ignores them.

    The cheapest correct implementation is simply `return x`; that is what we
    do whenever a lane-dense (multiple-of-128) view is not possible or the
    caller sets use_pallas=False.  Otherwise we run the optimized Pallas copy
    kernel: tiled, lane-dense, input/output aliased.
    """
    total = x.size
    if (not use_pallas) or total == 0 or total % _LANE != 0:
        # Identity — exact semantics, no kernel launch / HBM traffic needed.
        return x

    rows = total // _LANE
    x2 = x.reshape(rows, _LANE)  # lane-dense 2D view (last dim = 128 lanes)

    # Full-extent block when small (always legal); otherwise 1024-row blocks
    # (multiple of 8/16/32 sublanes for f32/bf16/int8) tiled over the grid.
    block_rows = rows if rows <= _MAX_BLOCK_ROWS else _MAX_BLOCK_ROWS
    grid = (pl.cdiv(rows, block_rows),)

    y2 = pl.pallas_call(
        _copy_kernel,
        out_shape=jax.ShapeDtypeStruct((rows, _LANE), x.dtype),
        grid=grid,
        in_specs=[pl.BlockSpec((block_rows, _LANE), lambda i: (i, 0))],
        out_specs=pl.BlockSpec((block_rows, _LANE), lambda i: (i, 0)),
        # Output aliases the input buffer: no new HBM allocation when donated.
        input_output_aliases={0: 0},
        compiler_params=pltpu.CompilerParams(
            dimension_semantics=("parallel",),  # shard grid across v7x's 2 TCs
        ),
    )(x2)
    return y2.reshape(x.shape)


if __name__ == "__main__":
    key = jax.random.PRNGKey(0)
    k1, k2, k3 = jax.random.split(key, 3)

    # Small "set" input: batch=2, set_size=8, feature_dim=32 (total = 512 -> 4x128).
    B, N, D = 2, 8, 32
    x = jax.random.normal(k1, (B, N, D), dtype=jnp.float32)
    y = setnet_forward(x, input_dim=D, output_dim=D)
    y = jax.block_until_ready(y)
    assert y.shape == x.shape and y.dtype == x.dtype
    assert bool(jnp.all(y == x))

    # Larger input exercising the multi-block tiled path (rows=4096, grid=(4,)).
    xb = jax.random.normal(k2, (4, 512, 256), dtype=jnp.float32)
    yb = jax.block_until_ready(setnet_forward(xb, input_dim=256, output_dim=256))
    assert yb.shape == xb.shape and bool(jnp.all(yb == xb))

    # Non-lane-dense total (2*3*5=30): falls back to the zero-cost identity path.
    xs = jax.random.normal(k3, (2, 3, 5), dtype=jnp.float32)
    ys = jax.block_until_ready(setnet_forward(xs, input_dim=5, output_dim=5))
    assert ys.shape == xs.shape and bool(jnp.all(ys == xs))

    print("KERNEL_OK")
</pallas_src>

<mosaic_0001>
module attributes {stable_mosaic.version = 11 : i64} {
  func.func @_copy_kernel(%arg0: i32, %arg1: memref<4x128xf32, #tpu.memory_space<vmem>>, %arg2: memref<4x128xf32, #tpu.memory_space<vmem>>) attributes {dimension_semantics = [#tpu.dimension_semantics<parallel>], iteration_bounds = array<i64: 1>, scalar_prefetch = 0 : i64, scratch_operands = 0 : i64, tpu.core_type = #tpu.core_type<tc>, window_params = [{transform_indices = @transform_0, window_bounds = array<i64: 4, 128>}, {transform_indices = @transform_1, window_bounds = array<i64: 4, 128>}]} {
    %c0 = arith.constant 0 : index
    %c0_0 = arith.constant 0 : index
    %0 = vector.load %arg1[%c0, %c0_0] : memref<4x128xf32, #tpu.memory_space<vmem>>, vector<4x128xf32>
    %c0_1 = arith.constant 0 : index
    %c0_2 = arith.constant 0 : index
    %1 = vector.load %arg2[%c0_1, %c0_2] : memref<4x128xf32, #tpu.memory_space<vmem>>, vector<4x128xf32>
    tpu.vector_store %arg2[%c0_1, %c0_2], %0 {strides = array<i32>} : memref<4x128xf32, #tpu.memory_space<vmem>>, vector<4x128xf32>,
    return
  }
  func.func @transform_0(%arg0: i32) -> (i32, i32) {
    %c0_i32 = arith.constant 0 : i32
    %c0_i32_0 = arith.constant 0 : i32
    return %arg0, %c0_i32 : i32, i32
  }
  func.func @transform_1(%arg0: i32) -> (i32, i32) {
    %c0_i32 = arith.constant 0 : i32
    %c0_i32_0 = arith.constant 0 : i32
    return %arg0, %c0_i32 : i32, i32
  }
}

</mosaic_0001>

<bundles_post_ra>
// kernel: tpu_custom_call.1
= control target key start
LH: loop header
LB: loop body
LE: loop exit
PB: predicated region body
PF: predicated region fallthrough
CT: control target
= control target key end

     0   :  { %6 = vsyncpa [#allocation3], 0  ;;  %s124_s0 = inlined_call_operand.hbm [shape: f32[4,128], index: 0, kind: input, shape index: {}, may-alias: {0,1}]   ;;  %s125_s1 = inlined_call_operand.hbm [shape: f32[4,128], index: 1, kind: output, shape index: {}, may-alias: {0,1}]  }
   0x1   :  { %7 = vsyncpa [#allocation4], 0  ;;  %s88_s6 = smov [#allocation2]   ;;  %s40_s10 = scalar_lea.hbm %s124_s0, 64 }
   0x2   :  { %s14_s7 = sshll.u32 %s88_s6, 4  ;;  %p41_p0 = scmp.ne.s32.totalorder %s124_s0, %s40_s10  ;;  %s15_s7 = int_to_ptr.vmem [resolvable:$true] %s14_s7 }
   0x3   :  { %p44_p1 = scmp.lt.u32.totalorder %s40_s10, %s124_s0 }
   0x5   :  { %p46_p2 = pnand %p44_p1, %p41_p0 }
   0x7   :  { %49 = shalt.err (!%p46_p2)
}
   0x8   :  { %s50_s15 = scalar_lea.vmem %s15_s7, 64  ;;  %p55_p4 = scmp.lt.s32.totalorder %s15_s7, %s15_s7 }
   0x9   :  { %p51_p3 = scmp.ne.s32.totalorder %s15_s7, %s50_s15  ;;  %p56_p5 = scmp.lt.s32.totalorder %s50_s15, %s50_s15 }
   0xb   :  { %p57_p6 = por %p56_p5, %p55_p4 }
   0xd   :  { %p58_p7 = pnand %p57_p6, %p51_p3 }
   0xf   :  { %61 = shalt.err (!%p58_p7)
}
  0x10   :  { %17 = dma.hbm_to_vmem [thread:$0]  %s124_s0, 64, %s15_s7, [#allocation3]  }
  0x11   :  { %84 = dma.done.wait [#allocation3], 64  }
  0x12   :  { %85 = vsyncadd [#allocation3], 4294967232  ;;  %s89_s18 = smov [#allocation5]   ;;  %v21_v0 = vld [vmem:[#allocation2] sm:$0xf] }
  0x13   :  { %s29_s19 = sshll.u32 %s89_s18, 4  ;;  %22 = vst [vmem:[#allocation5] sm:$0xf] %v21_v0  ;;  %s30_s19 = int_to_ptr.vmem [resolvable:$true] %s29_s19 }
  0x14   :  { %s62_s20 = scalar_lea.vmem %s30_s19, 64  ;;  %p67_p9 = scmp.lt.s32.totalorder %s30_s19, %s30_s19 }
  0x15   :  { %p63_p8 = scmp.ne.s32.totalorder %s30_s19, %s62_s20  ;;  %p68_p10 = scmp.lt.s32.totalorder %s62_s20, %s62_s20 }
  0x17   :  { %p69_p11 = por %p68_p10, %p67_p9 }
  0x19   :  { %p70_p12 = pnand %p69_p11, %p63_p8 }
  0x1b   :  { %73 = shalt.err (!%p70_p12)
}
  0x1c   :  { %s74_s23 = scalar_lea.hbm %s125_s1, 64 }
  0x1d   :  { %p75_p13 = scmp.ne.s32.totalorder %s125_s1, %s74_s23  ;;  %p78_p0 = scmp.lt.u32.totalorder %s74_s23, %s125_s1 }
  0x1f   :  { %p80_p1 = pnand %p78_p0, %p75_p13 }
  0x21   :  { %83 = shalt.err (!%p80_p1)
}
  0x22   :  { %32 = dma.vmem_to_hbm [thread:$0]  %s30_s19, 64, %s125_s1, [#allocation4]  }
  0x23   :  { %86 = dma.done.wait [#allocation4], 64  }
  0x24   :  { %87 = vsyncadd [#allocation4], 4294967232 }
  0x25   :  { %36 = vsyncpa [#allocation3], 1 }
  0x26   :  { %37 = vsyncpa [#allocation4], 1 }

</bundles_post_ra>
